<compile_context>
chip_gen: v7x
topology: tpu7x:2x2x1
jax: 0.10.0
libtpu: 0.0.40
codegen_flags: <defaults>
</compile_context>

<pallas_src>
import functools

import jax
import jax.numpy as jnp
from jax.experimental import pallas as pl
from jax.experimental.pallas import tpu as pltpu


def _softplus(x):
    # Matches torch.nn.Softplus(beta=1): log(1 + exp(x)), numerically stable.
    return jnp.maximum(x, 0.0) + jnp.log1p(jnp.exp(-jnp.abs(x)))


def _make_kernel(monotonicity, n_grad, tb):
    """Fused ConvexNet-inference kernel: n_grad grad-layers, TB rows/tile."""

    def kernel(*refs):
        x_ref = refs[0]
        grad_refs = refs[1:1 + 2 * n_grad]               # (W_sq_t, b) pairs
        vtv_ref = refs[1 + 2 * n_grad]                   # precomputed V^T V
        rw1, rb1, rw2, rb2, rw3, rb3 = refs[2 + 2 * n_grad:8 + 2 * n_grad]
        out_ref = refs[8 + 2 * n_grad]

        x = x_ref[...]                                   # (TB, D)

        # ---- monotonic expert: weights already hold monotonicity*square(W).T
        h = x
        for l in range(n_grad):                          # static unroll
            w = grad_refs[2 * l][...]                    # (in_l, out_l)
            b = grad_refs[2 * l + 1][...]                # (1, out_l)
            h = jnp.dot(h, w, preferred_element_type=jnp.float32) + b
            h = monotonicity * _softplus(h)
        x_mono = h                                       # (TB, D)

        # ---- monotone expert: x @ (V^T V), Gram matrix precomputed ----
        x_lin = jnp.dot(x, vtv_ref[...], preferred_element_type=jnp.float32)

        # ---- Router MLP, single pass over both experts (concat on sublanes)
        z = jnp.concatenate([x_mono, x_lin], axis=0)     # (2*TB, D)
        h1 = _softplus(
            jnp.dot(z, rw1[...], preferred_element_type=jnp.float32) + rb1[...])
        h2 = _softplus(
            jnp.dot(h1, rw2[...], preferred_element_type=jnp.float32) + rb2[...])
        r = jnp.dot(h2, rw3[...], preferred_element_type=jnp.float32) + rb3[...]
        r_mono = r[:tb]                                  # stack index 0
        r_lin = r[tb:]                                   # stack index 1

        # 2-way softmax over the expert axis == sigmoid of the logit delta.
        # ew[:,1,:] = exp(r_lin) / (exp(r_mono)+exp(r_lin)) = 1/(1+exp(r_mono-r_lin))
        w1 = 1.0 / (1.0 + jnp.exp(r_mono - r_lin))       # expert_weights[:, 1, :]

        # out = x_mono*ew[:,1,:] + x_lin*ew[:,0,:] = x_lin + (x_mono-x_lin)*ew[:,1,:]
        out_ref[...] = x_lin + (x_mono - x_lin) * w1

    return kernel


def _pick_tile(B):
    """Largest batch tile (multiple of 8, <=512) dividing B; else B itself."""
    for tb in (512, 256, 128, 64, 32, 16, 8):
        if B % tb == 0:
            return tb
    return B


def convexnet_inference(x, grad_weights, grad_biases, V,
                        router_params, monotonicity=1.0):
    """Pallas-backed ConvexNet forward (mode='inference').

    x:             (B, D) float32
    grad_weights:  list of (out_l, in_l) float32   (PyTorch layout)
    grad_biases:   list of (out_l,) float32
    V:             (dimV, D) float32
    router_params: [(W1,b1),(W2,b2),(W3,b3)] in PyTorch (out,in)/(out,) layout
    """
    x = jnp.asarray(x, jnp.float32)
    B, D = x.shape
    n_grad = len(grad_weights)
    TB = _pick_tile(B)
    monotonicity = float(monotonicity)

    # ---- wrapper-side (batch-invariant) parameter prep: glue, not hot path ----
    inputs = [x]
    for w, b in zip(grad_weights, grad_biases):
        w = jnp.asarray(w, jnp.float32)
        inputs.append((monotonicity * jnp.square(w)).T)          # (in, out)
        inputs.append(jnp.asarray(b, jnp.float32).reshape(1, -1))
    V = jnp.asarray(V, jnp.float32)
    inputs.append(V.T @ V)                                       # (D, D)

    (w1, b1), (w2, b2), (w3, b3) = router_params
    w1 = jnp.asarray(w1, jnp.float32); b1 = jnp.asarray(b1, jnp.float32)
    w2 = jnp.asarray(w2, jnp.float32); b2 = jnp.asarray(b2, jnp.float32)
    w3 = jnp.asarray(w3, jnp.float32); b3 = jnp.asarray(b3, jnp.float32)
    RH = w1.shape[0]                                             # router hidden (100)
    RHp = max(128, ((RH + 127) // 128) * 128)                    # lane-aligned
    pad = RHp - RH
    inputs += [
        jnp.pad(w1.T, ((0, 0), (0, pad))),                       # (D, RHp)
        jnp.pad(b1.reshape(1, -1), ((0, 0), (0, pad))),          # (1, RHp)
        jnp.pad(w2.T, ((0, pad), (0, pad))),                     # (RHp, RHp)
        jnp.pad(b2.reshape(1, -1), ((0, 0), (0, pad))),          # (1, RHp)
        jnp.pad(w3.T, ((0, pad), (0, 0))),                       # (RHp, D)
        b3.reshape(1, -1),                                       # (1, D)
    ]

    x_spec = pl.BlockSpec((TB, D), lambda i: (i, 0))
    # Parameters: full-array blocks with constant index_maps -> VMEM-resident.
    param_specs = [
        pl.BlockSpec(a.shape,
                     functools.partial(lambda _i, nd: (0,) * nd, nd=a.ndim))
        for a in inputs[1:]
    ]
    out_spec = pl.BlockSpec((TB, D), lambda i: (i, 0))

    kernel = _make_kernel(monotonicity, n_grad, TB)

    return pl.pallas_call(
        kernel,
        out_shape=jax.ShapeDtypeStruct((B, D), jnp.float32),
        grid=(B // TB,),
        in_specs=[x_spec] + param_specs,
        out_specs=out_spec,
        compiler_params=pltpu.CompilerParams(
            dimension_semantics=("parallel",)),
    )(*inputs)


def _reference(x, grad_weights, grad_biases, V, router_params, monotonicity=1.0):
    """Pure-JAX reference mirroring the PyTorch forward (mode='inference')."""
    h = x
    for w, b in zip(grad_weights, grad_biases):
        h = h @ (monotonicity * jnp.square(w)).T + b
        h = monotonicity * jax.nn.softplus(h)
    x_mono = h
    x_lin = x @ (V.T @ V)

    def router(z):
        (w1, b1), (w2, b2), (w3, b3) = router_params
        z = jax.nn.softplus(z @ w1.T + b1)
        z = jax.nn.softplus(z @ w2.T + b2)
        return z @ w3.T + b3

    stacked = jnp.stack((router(x_mono), router(x_lin)), axis=1)  # (B, 2, D)
    ew = jax.nn.softmax(stacked, axis=1)
    return x_mono * ew[:, 1, :] + x_lin * ew[:, 0, :]


if __name__ == "__main__":
    # Small shapes consistent with the module: layer_sizes=(16, 32, 16),
    # dimV=32, router hidden = 100 (hard-coded in the module), batch = 8.
    B, D, H, dimV, RH = 8, 16, 32, 32, 100

    key = jax.random.PRNGKey(0)
    keys = jax.random.split(key, 12)

    x = jax.random.normal(keys[0], (B, D), jnp.float32)

    grad_weights = [
        0.3 * jax.random.normal(keys[1], (H, D), jnp.float32),
        0.3 * jax.random.normal(keys[2], (D, H), jnp.float32),
    ]
    grad_biases = [
        0.1 * jax.random.normal(keys[3], (H,), jnp.float32),
        0.1 * jax.random.normal(keys[4], (D,), jnp.float32),
    ]
    V = 0.2 * jax.random.normal(keys[5], (dimV, D), jnp.float32)
    router_params = [
        (0.2 * jax.random.normal(keys[6], (RH, D), jnp.float32),
         0.1 * jax.random.normal(keys[7], (RH,), jnp.float32)),
        (0.2 * jax.random.normal(keys[8], (RH, RH), jnp.float32),
         0.1 * jax.random.normal(keys[9], (RH,), jnp.float32)),
        (0.2 * jax.random.normal(keys[10], (D, RH), jnp.float32),
         0.1 * jax.random.normal(keys[11], (D,), jnp.float32)),
    ]

    out = convexnet_inference(x, grad_weights, grad_biases, V,
                              router_params, monotonicity=1.0)
    out = jax.block_until_ready(out)

    ref = _reference(x, grad_weights, grad_biases, V, router_params, 1.0)
    assert out.shape == (B, D)
    assert jnp.allclose(out, ref, rtol=1e-4, atol=1e-4), "mismatch vs reference"

    print("KERNEL_OK")
</pallas_src>

<mosaic_0001>
module attributes {stable_mosaic.version = 11 : i64} {
  func.func @kernel(%arg0: i32, %arg1: memref<8x16xf32, #tpu.memory_space<vmem>>, %arg2: memref<16x32xf32, #tpu.memory_space<vmem>>, %arg3: memref<1x32xf32, #tpu.memory_space<vmem>>, %arg4: memref<32x16xf32, #tpu.memory_space<vmem>>, %arg5: memref<1x16xf32, #tpu.memory_space<vmem>>, %arg6: memref<16x16xf32, #tpu.memory_space<vmem>>, %arg7: memref<16x128xf32, #tpu.memory_space<vmem>>, %arg8: memref<1x128xf32, #tpu.memory_space<vmem>>, %arg9: memref<128x128xf32, #tpu.memory_space<vmem>>, %arg10: memref<1x128xf32, #tpu.memory_space<vmem>>, %arg11: memref<128x16xf32, #tpu.memory_space<vmem>>, %arg12: memref<1x16xf32, #tpu.memory_space<vmem>>, %arg13: memref<8x16xf32, #tpu.memory_space<vmem>>) attributes {dimension_semantics = [#tpu.dimension_semantics<parallel>], iteration_bounds = array<i64: 1>, scalar_prefetch = 0 : i64, scratch_operands = 0 : i64, tpu.core_type = #tpu.core_type<tc>, window_params = [{transform_indices = @transform_0, window_bounds = array<i64: 8, 16>}, {pipeline_mode = #tpu.pipeline_mode<synchronous>, transform_indices = @transform_1, window_bounds = array<i64: 16, 32>}, {pipeline_mode = #tpu.pipeline_mode<synchronous>, transform_indices = @transform_2, window_bounds = array<i64: 1, 32>}, {pipeline_mode = #tpu.pipeline_mode<synchronous>, transform_indices = @transform_3, window_bounds = array<i64: 32, 16>}, {pipeline_mode = #tpu.pipeline_mode<synchronous>, transform_indices = @transform_4, window_bounds = array<i64: 1, 16>}, {pipeline_mode = #tpu.pipeline_mode<synchronous>, transform_indices = @transform_5, window_bounds = array<i64: 16, 16>}, {pipeline_mode = #tpu.pipeline_mode<synchronous>, transform_indices = @transform_6, window_bounds = array<i64: 16, 128>}, {pipeline_mode = #tpu.pipeline_mode<synchronous>, transform_indices = @transform_7, window_bounds = array<i64: 1, 128>}, {pipeline_mode = #tpu.pipeline_mode<synchronous>, transform_indices = @transform_8, window_bounds = array<i64: 128, 128>}, {pipeline_mode = #tpu.pipeline_mode<synchronous>, transform_indices = @transform_9, window_bounds = array<i64: 1, 128>}, {pipeline_mode = #tpu.pipeline_mode<synchronous>, transform_indices = @transform_10, window_bounds = array<i64: 128, 16>}, {pipeline_mode = #tpu.pipeline_mode<synchronous>, transform_indices = @transform_11, window_bounds = array<i64: 1, 16>}, {transform_indices = @transform_12, window_bounds = array<i64: 8, 16>}]} {
    %c0 = arith.constant 0 : index
    %c0_0 = arith.constant 0 : index
    %0 = vector.load %arg1[%c0, %c0_0] : memref<8x16xf32, #tpu.memory_space<vmem>>, vector<8x16xf32>
    %c0_1 = arith.constant 0 : index
    %c0_2 = arith.constant 0 : index
    %1 = vector.load %arg2[%c0_1, %c0_2] : memref<16x32xf32, #tpu.memory_space<vmem>>, vector<16x32xf32>
    %c0_3 = arith.constant 0 : index
    %c0_4 = arith.constant 0 : index
    %2 = vector.load %arg3[%c0_3, %c0_4] : memref<1x32xf32, #tpu.memory_space<vmem>>, vector<1x32xf32>
    %cst = arith.constant dense<0.000000e+00> : vector<8x32xf32>
    %3 = tpu.matmul %0, %1, %cst {dimension_numbers = #tpu.dot_dimension_numbers<[1], [0], [0], [1], [0, 0, 1, 1], [], []>} : vector<8x16xf32>, vector<16x32xf32>, vector<8x32xf32> -> vector<8x32xf32>
    %4 = vector.broadcast %2 : vector<1x32xf32> to vector<8x32xf32>
    %5 = arith.addf %3, %4 : vector<8x32xf32>
    %cst_5 = arith.constant 0.000000e+00 : f32
    %6 = vector.broadcast %cst_5 : f32 to vector<8x32xf32>
    %7 = arith.maximumf %5, %6 : vector<8x32xf32>
    %8 = math.absf %5 : vector<8x32xf32>
    %cst_6 = arith.constant 0.000000e+00 : f32
    %9 = vector.broadcast %cst_6 : f32 to vector<8x32xf32>
    %10 = arith.subf %9, %8 : vector<8x32xf32>
    %11 = math.exp %10 : vector<8x32xf32>
    %12 = math.log1p %11 : vector<8x32xf32>
    %13 = arith.addf %7, %12 : vector<8x32xf32>
    %cst_7 = arith.constant 1.000000e+00 : f32
    %14 = vector.broadcast %cst_7 : f32 to vector<8x32xf32>
    %15 = arith.mulf %14, %13 : vector<8x32xf32>
    %c0_8 = arith.constant 0 : index
    %c0_9 = arith.constant 0 : index
    %16 = vector.load %arg4[%c0_8, %c0_9] : memref<32x16xf32, #tpu.memory_space<vmem>>, vector<32x16xf32>
    %c0_10 = arith.constant 0 : index
    %c0_11 = arith.constant 0 : index
    %17 = vector.load %arg5[%c0_10, %c0_11] : memref<1x16xf32, #tpu.memory_space<vmem>>, vector<1x16xf32>
    %cst_12 = arith.constant dense<0.000000e+00> : vector<8x16xf32>
    %18 = tpu.matmul %15, %16, %cst_12 {dimension_numbers = #tpu.dot_dimension_numbers<[1], [0], [0], [1], [0, 0, 1, 1], [], []>} : vector<8x32xf32>, vector<32x16xf32>, vector<8x16xf32> -> vector<8x16xf32>
    %19 = vector.broadcast %17 : vector<1x16xf32> to vector<8x16xf32>
    %20 = arith.addf %18, %19 : vector<8x16xf32>
    %cst_13 = arith.constant 0.000000e+00 : f32
    %21 = vector.broadcast %cst_13 : f32 to vector<8x16xf32>
    %22 = arith.maximumf %20, %21 : vector<8x16xf32>
    %23 = math.absf %20 : vector<8x16xf32>
    %cst_14 = arith.constant 0.000000e+00 : f32
    %24 = vector.broadcast %cst_14 : f32 to vector<8x16xf32>
    %25 = arith.subf %24, %23 : vector<8x16xf32>
    %26 = math.exp %25 : vector<8x16xf32>
    %27 = math.log1p %26 : vector<8x16xf32>
    %28 = arith.addf %22, %27 : vector<8x16xf32>
    %cst_15 = arith.constant 1.000000e+00 : f32
    %29 = vector.broadcast %cst_15 : f32 to vector<8x16xf32>
    %30 = arith.mulf %29, %28 : vector<8x16xf32>
    %c0_16 = arith.constant 0 : index
    %c0_17 = arith.constant 0 : index
    %31 = vector.load %arg6[%c0_16, %c0_17] : memref<16x16xf32, #tpu.memory_space<vmem>>, vector<16x16xf32>
    %cst_18 = arith.constant dense<0.000000e+00> : vector<8x16xf32>
    %32 = tpu.matmul %0, %31, %cst_18 {dimension_numbers = #tpu.dot_dimension_numbers<[1], [0], [0], [1], [0, 0, 1, 1], [], []>} : vector<8x16xf32>, vector<16x16xf32>, vector<8x16xf32> -> vector<8x16xf32>
    %33 = tpu.concatenate %30, %32 in 0 : vector<8x16xf32>, vector<8x16xf32> -> vector<16x16xf32>
    %c0_19 = arith.constant 0 : index
    %c0_20 = arith.constant 0 : index
    %34 = vector.load %arg7[%c0_19, %c0_20] : memref<16x128xf32, #tpu.memory_space<vmem>>, vector<16x128xf32>
    %cst_21 = arith.constant dense<0.000000e+00> : vector<16x128xf32>
    %35 = tpu.matmul %33, %34, %cst_21 {dimension_numbers = #tpu.dot_dimension_numbers<[1], [0], [0], [1], [0, 0, 1, 1], [], []>} : vector<16x16xf32>, vector<16x128xf32>, vector<16x128xf32> -> vector<16x128xf32>
    %c0_22 = arith.constant 0 : index
    %c0_23 = arith.constant 0 : index
    %36 = vector.load %arg8[%c0_22, %c0_23] : memref<1x128xf32, #tpu.memory_space<vmem>>, vector<1x128xf32>
    %37 = vector.broadcast %36 : vector<1x128xf32> to vector<16x128xf32>
    %38 = arith.addf %35, %37 : vector<16x128xf32>
    %cst_24 = arith.constant 0.000000e+00 : f32
    %39 = vector.broadcast %cst_24 : f32 to vector<16x128xf32>
    %40 = arith.maximumf %38, %39 : vector<16x128xf32>
    %41 = math.absf %38 : vector<16x128xf32>
    %cst_25 = arith.constant 0.000000e+00 : f32
    %42 = vector.broadcast %cst_25 : f32 to vector<16x128xf32>
    %43 = arith.subf %42, %41 : vector<16x128xf32>
    %44 = math.exp %43 : vector<16x128xf32>
    %45 = math.log1p %44 : vector<16x128xf32>
    %46 = arith.addf %40, %45 : vector<16x128xf32>
    %c0_26 = arith.constant 0 : index
    %c0_27 = arith.constant 0 : index
    %47 = vector.load %arg9[%c0_26, %c0_27] : memref<128x128xf32, #tpu.memory_space<vmem>>, vector<128x128xf32>
    %cst_28 = arith.constant dense<0.000000e+00> : vector<16x128xf32>
    %48 = tpu.matmul %46, %47, %cst_28 {dimension_numbers = #tpu.dot_dimension_numbers<[1], [0], [0], [1], [0, 0, 1, 1], [], []>} : vector<16x128xf32>, vector<128x128xf32>, vector<16x128xf32> -> vector<16x128xf32>
    %c0_29 = arith.constant 0 : index
    %c0_30 = arith.constant 0 : index
    %49 = vector.load %arg10[%c0_29, %c0_30] : memref<1x128xf32, #tpu.memory_space<vmem>>, vector<1x128xf32>
    %50 = vector.broadcast %49 : vector<1x128xf32> to vector<16x128xf32>
    %51 = arith.addf %48, %50 : vector<16x128xf32>
    %cst_31 = arith.constant 0.000000e+00 : f32
    %52 = vector.broadcast %cst_31 : f32 to vector<16x128xf32>
    %53 = arith.maximumf %51, %52 : vector<16x128xf32>
    %54 = math.absf %51 : vector<16x128xf32>
    %cst_32 = arith.constant 0.000000e+00 : f32
    %55 = vector.broadcast %cst_32 : f32 to vector<16x128xf32>
    %56 = arith.subf %55, %54 : vector<16x128xf32>
    %57 = math.exp %56 : vector<16x128xf32>
    %58 = math.log1p %57 : vector<16x128xf32>
    %59 = arith.addf %53, %58 : vector<16x128xf32>
    %c0_33 = arith.constant 0 : index
    %c0_34 = arith.constant 0 : index
    %60 = vector.load %arg11[%c0_33, %c0_34] : memref<128x16xf32, #tpu.memory_space<vmem>>, vector<128x16xf32>
    %cst_35 = arith.constant dense<0.000000e+00> : vector<16x16xf32>
    %61 = tpu.matmul %59, %60, %cst_35 {dimension_numbers = #tpu.dot_dimension_numbers<[1], [0], [0], [1], [0, 0, 1, 1], [], []>} : vector<16x128xf32>, vector<128x16xf32>, vector<16x16xf32> -> vector<16x16xf32>
    %c0_36 = arith.constant 0 : index
    %c0_37 = arith.constant 0 : index
    %62 = vector.load %arg12[%c0_36, %c0_37] : memref<1x16xf32, #tpu.memory_space<vmem>>, vector<1x16xf32>
    %63 = vector.broadcast %62 : vector<1x16xf32> to vector<16x16xf32>
    %64 = arith.addf %61, %63 : vector<16x16xf32>
    %65 = vector.extract_strided_slice %64 {offsets = [0, 0], sizes = [8, 16], strides = [1, 1]} : vector<16x16xf32> to vector<8x16xf32>
    %66 = vector.extract_strided_slice %64 {offsets = [8, 0], sizes = [8, 16], strides = [1, 1]} : vector<16x16xf32> to vector<8x16xf32>
    %67 = arith.subf %65, %66 : vector<8x16xf32>
    %68 = math.exp %67 : vector<8x16xf32>
    %cst_38 = arith.constant 1.000000e+00 : f32
    %69 = vector.broadcast %cst_38 : f32 to vector<8x16xf32>
    %70 = arith.addf %69, %68 : vector<8x16xf32>
    %cst_39 = arith.constant 1.000000e+00 : f32
    %71 = vector.broadcast %cst_39 : f32 to vector<8x16xf32>
    %72 = arith.divf %71, %70 : vector<8x16xf32>
    %73 = arith.subf %30, %32 : vector<8x16xf32>
    %74 = arith.mulf %73, %72 : vector<8x16xf32>
    %75 = arith.addf %32, %74 : vector<8x16xf32>
    %c0_40 = arith.constant 0 : index
    %c0_41 = arith.constant 0 : index
    %76 = vector.load %arg13[%c0_40, %c0_41] : memref<8x16xf32, #tpu.memory_space<vmem>>, vector<8x16xf32>
    tpu.vector_store %arg13[%c0_40, %c0_41], %75 {strides = array<i32>} : memref<8x16xf32, #tpu.memory_space<vmem>>, vector<8x16xf32>,
    return
  }
  func.func @transform_0(%arg0: i32) -> (i32, i32) {
    %c0_i32 = arith.constant 0 : i32
    %c0_i32_0 = arith.constant 0 : i32
    return %arg0, %c0_i32 : i32, i32
  }
  func.func @transform_1(%arg0: i32) -> (i32, i32) {
    %c0_i32 = arith.constant 0 : i32
    %c0_i32_0 = arith.constant 0 : i32
    %c0_i32_1 = arith.constant 0 : i32
    return %c0_i32, %c0_i32_0 : i32, i32
  }
  func.func @transform_2(%arg0: i32) -> (i32, i32) {
    %c0_i32 = arith.constant 0 : i32
    %c0_i32_0 = arith.constant 0 : i32
    %c0_i32_1 = arith.constant 0 : i32
    return %c0_i32, %c0_i32_0 : i32, i32
  }
  func.func @transform_3(%arg0: i32) -> (i32, i32) {
    %c0_i32 = arith.constant 0 : i32
    %c0_i32_0 = arith.constant 0 : i32
    %c0_i32_1 = arith.constant 0 : i32
    return %c0_i32, %c0_i32_0 : i32, i32
  }
  func.func @transform_4(%arg0: i32) -> (i32, i32) {
    %c0_i32 = arith.constant 0 : i32
    %c0_i32_0 = arith.constant 0 : i32
    %c0_i32_1 = arith.constant 0 : i32
    return %c0_i32, %c0_i32_0 : i32, i32
  }
  func.func @transform_5(%arg0: i32) -> (i32, i32) {
    %c0_i32 = arith.constant 0 : i32
    %c0_i32_0 = arith.constant 0 : i32
    %c0_i32_1 = arith.constant 0 : i32
    return %c0_i32, %c0_i32_0 : i32, i32
  }
  func.func @transform_6(%arg0: i32) -> (i32, i32) {
    %c0_i32 = arith.constant 0 : i32
    %c0_i32_0 = arith.constant 0 : i32
    %c0_i32_1 = arith.constant 0 : i32
    return %c0_i32, %c0_i32_0 : i32, i32
  }
  func.func @transform_7(%arg0: i32) -> (i32, i32) {
    %c0_i32 = arith.constant 0 : i32
    %c0_i32_0 = arith.constant 0 : i32
    %c0_i32_1 = arith.constant 0 : i32
    return %c0_i32, %c0_i32_0 : i32, i32
  }
  func.func @transform_8(%arg0: i32) -> (i32, i32) {
    %c0_i32 = arith.constant 0 : i32
    %c0_i32_0 = arith.constant 0 : i32
    %c0_i32_1 = arith.constant 0 : i32
    return %c0_i32, %c0_i32_0 : i32, i32
  }
  func.func @transform_9(%arg0: i32) -> (i32, i32) {
    %c0_i32 = arith.constant 0 : i32
    %c0_i32_0 = arith.constant 0 : i32
    %c0_i32_1 = arith.constant 0 : i32
    return %c0_i32, %c0_i32_0 : i32, i32
  }
  func.func @transform_10(%arg0: i32) -> (i32, i32) {
    %c0_i32 = arith.constant 0 : i32
    %c0_i32_0 = arith.constant 0 : i32
    %c0_i32_1 = arith.constant 0 : i32
    return %c0_i32, %c0_i32_0 : i32, i32
  }
  func.func @transform_11(%arg0: i32) -> (i32, i32) {
    %c0_i32 = arith.constant 0 : i32
    %c0_i32_0 = arith.constant 0 : i32
    %c0_i32_1 = arith.constant 0 : i32
    return %c0_i32, %c0_i32_0 : i32, i32
  }
  func.func @transform_12(%arg0: i32) -> (i32, i32) {
    %c0_i32 = arith.constant 0 : i32
    %c0_i32_0 = arith.constant 0 : i32
    return %arg0, %c0_i32 : i32, i32
  }
}

</mosaic_0001>

<bundles_post_ra>
// kernel: tpu_custom_call.1
= control target key start
LH: loop header
LB: loop body
LE: loop exit
PB: predicated region body
PF: predicated region fallthrough
CT: control target
= control target key end

     0   :  { %v982_v2 = vmov 0.0|0.0   ;;  %vm983_vm0 = vmmov 0   ;;  %v984_v4 = vmov 0.0   ;;  %s1224_s0 = inlined_call_operand.vmem [shape: f32[8,16], index: 0, kind: input, shape index: {}]   ;;  %s1225_s1 = inlined_call_operand.vmem [shape: f32[16,32], index: 1, kind: input, shape index: {}]   ;;  %s1226_s2 = inlined_call_operand.vmem [shape: f32[1,32], index: 2, kind: input, shape index: {}]   ;;  %s1227_s3 = inlined_call_operand.vmem [shape: f32[32,16], index: 3, kind: input, shape index: {}]   ;;  %s1228_s4 = inlined_call_operand.vmem [shape: f32[1,16], index: 4, kind: input, shape index: {}]   ;;  %s1229_s5 = inlined_call_operand.vmem [shape: f32[16,16], index: 5, kind: input, shape index: {}]   ;;  %s1230_s6 = inlined_call_operand.vmem [shape: f32[16,128], index: 6, kind: input, shape index: {}]   ;;  %s1231_s7 = inlined_call_operand.vmem [shape: f32[1,128], index: 7, kind: input, shape index: {}]   ;;  %s1232_s8 = inlined_call_operand.vmem [shape: f32[128,128], index: 8, kind: input, shape index: {}]   ;;  %s1233_s9 = inlined_call_operand.vmem [shape: f32[1,128], index: 9, kind: input, shape index: {}]   ;;  %s1234_s10 = inlined_call_operand.vmem [shape: f32[128,16], index: 10, kind: input, shape index: {}]   ;;  %s1235_s11 = inlined_call_operand.vmem [shape: f32[1,16], index: 11, kind: input, shape index: {}]   ;;  %s1236_s12 = inlined_call_operand.hbm [shape: f32[8,16], index: 12, kind: output, shape index: {}]  }
   0x1   :  { %v43_v0 = vld [vmem:[%s1225_s1] sm:$0xff]  ;;  %v44_v1 = vld [vmem:[%s1225_s1 + $0x8] sm:$0xff]  ;;  %846 = vmatprep.subr.bf16.mxu0 %v982_v2  ;;  %748 = vmatprep.mubr.msk.f32.mxu0 %vm983_vm0, %v984_v4 }
   0x2   :  { %v847_v3 = vpack.c.bf16 %v44_v1, %v43_v0 }
   0x3   :  { %17 = vsyncpa [#allocation3], 0  ;;  %849 = vmatprep.subr.bf16.mxu1 %v982_v2  ;;  %759 = vmatprep.mubr.msk.f32.mxu1 %vm983_vm0, %v984_v4  ;;  %v42_v5 = vld [vmem:[%s1224_s0] sm:$0xff]  ;;  %vm52_vm1 = vcmask 130048   ;;  %v142_v7 = vld [vmem:[%s1227_s3 + $0x8] sm:$0xff]  ;;  %vm152_vm3 = vcmask 261120  }
   0x4   :  { %848 = vmatpush3.bf16.msra.mxu0 %v847_v3  ;;  %v141_v6 = vld [vmem:[%s1227_s3] sm:$0xff]  ;;  %v143_v9 = vld [vmem:[%s1227_s3 + $0x10] sm:$0xff]  ;;  %v144_v10 = vld [vmem:[%s1227_s3 + $0x18] sm:$0xff]  ;;  %s985_s16 = smov [#allocation2]  }
   0x5   :  { %855 = vmatprep.subr.bf16.mxu0 %v982_v2  ;;  %v850_v8 = vpack.c.bf16 %v142_v7, %v141_v6  ;;  %v853_v11 = vpack.c.bf16 %v144_v10, %v143_v9  ;;  %v241_v12 = vld [vmem:[%s1229_s5] sm:$0xff]  ;;  %v242_v13 = vld [vmem:[%s1229_s5 + $0x8] sm:$0xff]  ;;  %v435_v60 = vld [vmem:[%s1232_s8 + $0x10] sm:$0xff]  ;;  %s675_s17 = sshll.u32 %s985_s16, 4  ;;  %s676_s17 = int_to_ptr.vmem [resolvable:$true] %s675_s17 }
   0x6   :  { %v856_v14 = vpack.c.bf16 %v242_v13, %v241_v12  ;;  %v683_v15 = vld [vmem:[%s1226_s2] ss:$0 sm:$0xff]  ;;  %v314_v34 = vld [vmem:[%s1230_s6 + $0x8] sm:$0xff]  ;;  %v436_v61 = vld [vmem:[%s1232_s8 + $0x18] sm:$0xff]  ;;  %p963_p1 = scmp.lt.s32.totalorder %s676_s17, %s676_s17 }
   0x7   :  { %749 = vmatmul.mubr.msk.f32.vlgmr.msra.gmra.mrb[0].mxu0 %vm52_vm1, %v42_v5  ;;  %851 = vmatpush3.bf16.msra.mxu1 %v850_v8  ;;  %v313_v33 = vld [vmem:[%s1230_s6] sm:$0xff]  ;;  %v434_v58 = vld [vmem:[%s1232_s8 + $0x8] sm:$0xff]  ;;  %v866_v62 = vpack.c.bf16 %v436_v61, %v435_v60  ;;  %v440_v3 = vld [vmem:[%s1232_s8 + $0x38] sm:$0xff] }
   0x8   :  { %766 = vmatprep.mubr.msk.f32.mxu0 %vm983_vm0, %v984_v4  ;;  %852 = vmatprep.subr.bf16.mxu1 %v982_v2  ;;  %v858_v35 = vpack.c.bf16 %v314_v34, %v313_v33  ;;  %v685_v38 = vld [vmem:[%s1228_s4] ss:$0 sm:$0xff]  ;;  %v438_v0 = vld [vmem:[%s1232_s8 + $0x28] sm:$0xff]  ;;  %v439_v2 = vld [vmem:[%s1232_s8 + $0x30] sm:$0xff] }
   0x9   :  { %857 = vmatpush3.bf16.msra.mxu0 %v856_v14  ;;  %v433_v57 = vld [vmem:[%s1232_s8] sm:$0xff]  ;;  %v874_v4 = vpack.c.bf16 %v440_v3, %v439_v2  ;;  %v442_v6 = vld [vmem:[%s1232_s8 + $0x48] sm:$0xff]  ;;  %v443_v8 = vld [vmem:[%s1232_s8 + $0x50] sm:$0xff] }
   0xa   :  { %859 = vmatprep.subr.bf16.mxu0 %v858_v35  ;;  %v862_v59 = vpack.c.bf16 %v434_v58, %v433_v57  ;;  %v437_v63 = vld [vmem:[%s1232_s8 + $0x20] sm:$0xff]  ;;  %v444_v9 = vld [vmem:[%s1232_s8 + $0x58] sm:$0xff]  ;;  %v446_v12 = vld [vmem:[%s1232_s8 + $0x68] sm:$0xff] }
   0xb   :  { %854 = vmatpush3.bf16.msra.mxu1 %v853_v11  ;;  %v870_v1 = vpack.c.bf16 %v438_v0, %v437_v63  ;;  %v882_v10 = vpack.c.bf16 %v444_v9, %v443_v8  ;;  %v445_v11 = vld [vmem:[%s1232_s8 + $0x60] sm:$0xff]  ;;  %v447_v14 = vld [vmem:[%s1232_s8 + $0x70] sm:$0xff]  ;;  %v564_v57 = vld [vmem:[%s1234_s10 + $0x18] sm:$0xff] }
   0xc   :  { %767 = vmatmul.mubr.msk.f32.vlgmr.msra.gmra.mrb[2].mxu0 %vm52_vm1, %v42_v5  ;;  %863 = vmatprep.subr.bf16.mxu1 %v862_v59  ;;  %v441_v5 = vld [vmem:[%s1232_s8 + $0x40] sm:$0xff]  ;;  %v886_v13 = vpack.c.bf16 %v446_v12, %v445_v11  ;;  %v566_v60 = vld [vmem:[%s1234_s10 + $0x28] sm:$0xff]  ;;  %v568_v63 = vld [vmem:[%s1234_s10 + $0x38] sm:$0xff] }
   0xd   :  { %861 = vmatpush3.bf16.msra.mxu0 %v858_v35  ;;  %v878_v7 = vpack.c.bf16 %v442_v6, %v441_v5  ;;  %v570_v2 = vld [vmem:[%s1234_s10 + $0x48] sm:$0xff]  ;;  %v572_v5 = vld [vmem:[%s1234_s10 + $0x58] sm:$0xff] }
   0xe   :  { %v574_v8 = vld [vmem:[%s1234_s10 + $0x68] sm:$0xff]  ;;  %v576_v11 = vld [vmem:[%s1234_s10 + $0x78] sm:$0xff] }
  0xda   :  { %v122_v16 = vpop.f32.mrb[0].mxu0 }
  0xdb   :  { %v123_v17 = vadd.f32 %v683_v15, %v122_v16  ;;  %v750_v18 = vpop.f32.mrb[1].mxu0  ;;  %v448_v15 = vld [vmem:[%s1232_s8 + $0x78] sm:$0xff] }
  0xdc   :  { %v890_v16 = vpack.c.bf16 %v448_v15, %v447_v14 }
  0xdd   :  { %v127_v19 = vand.u32 2147483647, %v123_v17  ;;  %v126_v30 = vmax.f32 %v123_v17, 0.0  ;;  %v688_v17 = vld [vmem:[%s1231_s7] ss:$0 sm:$0xff] }
  0xdf   :  { %v128_v20 = vsub.f32 0.0, %v127_v19  ;;  %v1089_v36 = vpop.f32.mrb[2].mxu0 }
  0xe0   :  { %v768_v37 = vpop.f32.mrb[3].mxu0 }
  0xe1   :  { %v129_v21 = vmul.f32 1.442695, %v128_v20 }
  0xe3   :  { %930 = vpow2.f32 %v129_v21 }
  0xed   :  { %v931_v22 = vpop.eup %930 }
  0xee   :  { %v131_v23 = vadd.f32 1.0, %v931_v22  ;;  %v134_v24 = vmul.f32 -0.5, %v931_v22  ;;  %v137_v26 = vand.u32 2147483647, %v931_v22 }
  0xf0   :  { %932 = vlog2.f32 %v131_v23  ;;  %v135_v25 = vadd.f32 1.0, %v134_v24  ;;  %vm138_vm2 = vcmp.lt.f32.partialorder %v137_v26, 0.0004427343 }
  0xf2   :  { %v136_v29 = vmul.f32 %v931_v22, %v135_v25 }
  0xfa   :  { %v933_v27 = vpop.eup %932 }
  0xfb   :  { %v133_v28 = vmul.f32 0.6931472, %v933_v27 }
  0xfd   :  { %v139_v31 = vsel %vm138_vm2, %v136_v29, %v133_v28 }
  0xfe   :  { %v140_v32 = vadd.f32 %v139_v31, %v126_v30 }
 0x100   :  { %760 = vmatmul.mubr.msk.f32.vlgmr.msra.gmra.mrb[0].mxu1 %vm152_vm3, %v140_v32 }
 0x101   :  { %865 = vmatpush3.bf16.msra.mxu1 %v862_v59  ;;  %v565_v59 = vld [vmem:[%s1234_s10 + $0x20] sm:$0xff] }
 0x102   :  { %867 = vmatprep.subr.bf16.mxu1 %v866_v62  ;;  %v902_v61 = vpack.c.bf16 %v566_v60, %v565_v59 }
 0x105   :  { %869 = vmatpush3.bf16.msra.mxu1 %v866_v62  ;;  %v567_v62 = vld [vmem:[%s1234_s10 + $0x30] sm:$0xff] }
 0x106   :  { %871 = vmatprep.subr.bf16.mxu1 %v870_v1  ;;  %v906_v0 = vpack.c.bf16 %v568_v63, %v567_v62 }
 0x109   :  { %873 = vmatpush3.bf16.msra.mxu1 %v870_v1  ;;  %v569_v1 = vld [vmem:[%s1234_s10 + $0x40] sm:$0xff] }
 0x10a   :  { %875 = vmatprep.subr.bf16.mxu1 %v874_v4  ;;  %v910_v3 = vpack.c.bf16 %v570_v2, %v569_v1 }
 0x10d   :  { %877 = vmatpush3.bf16.msra.mxu1 %v874_v4  ;;  %v571_v4 = vld [vmem:[%s1234_s10 + $0x50] sm:$0xff] }
 0x10e   :  { %879 = vmatprep.subr.bf16.mxu1 %v878_v7  ;;  %v914_v6 = vpack.c.bf16 %v572_v5, %v571_v4 }
 0x111   :  { %881 = vmatpush3.bf16.msra.mxu1 %v878_v7  ;;  %v573_v7 = vld [vmem:[%s1234_s10 + $0x60] sm:$0xff] }
 0x112   :  { %883 = vmatprep.subr.bf16.mxu1 %v882_v10  ;;  %v918_v9 = vpack.c.bf16 %v574_v8, %v573_v7 }
 0x115   :  { %885 = vmatpush3.bf16.msra.mxu1 %v882_v10  ;;  %v575_v10 = vld [vmem:[%s1234_s10 + $0x70] sm:$0xff] }
 0x116   :  { %887 = vmatprep.subr.bf16.mxu1 %v886_v13  ;;  %v922_v12 = vpack.c.bf16 %v576_v11, %v575_v10 }
 0x119   :  { %889 = vmatpush3.bf16.msra.mxu1 %v886_v13  ;;  %v691_v13 = vld [vmem:[%s1233_s9] ss:$0 sm:$0xff] }
 0x11a   :  { %891 = vmatprep.subr.bf16.mxu1 %v890_v16 }
 0x11d   :  { %893 = vmatpush3.bf16.msra.mxu1 %v890_v16 }
 0x1d3   :  { %v222_v39 = vpop.f32.mrb[0].mxu1 }
 0x1d4   :  { %v223_v40 = vadd.f32 %v685_v38, %v222_v39  ;;  %v761_v41 = vpop.f32.mrb[1].mxu1 }
 0x1d6   :  { %v227_v42 = vand.u32 2147483647, %v223_v40  ;;  %v226_v53 = vmax.f32 %v223_v40, 0.0 }
 0x1d8   :  { %v228_v43 = vsub.f32 0.0, %v227_v42 }
 0x1da   :  { %v229_v44 = vmul.f32 1.442695, %v228_v43 }
 0x1dc   :  { %934 = vpow2.f32 %v229_v44 }
 0x1e6   :  { %v935_v45 = vpop.eup %934 }
 0x1e7   :  { %v231_v46 = vadd.f32 1.0, %v935_v45  ;;  %v234_v47 = vmul.f32 -0.5, %v935_v45  ;;  %v237_v49 = vand.u32 2147483647, %v935_v45 }
 0x1e9   :  { %936 = vlog2.f32 %v231_v46  ;;  %v235_v48 = vadd.f32 1.0, %v234_v47  ;;  %vm238_vm4 = vcmp.lt.f32.partialorder %v237_v49, 0.0004427343 }
 0x1eb   :  { %v236_v52 = vmul.f32 %v935_v45, %v235_v48 }
 0x1f3   :  { %v937_v50 = vpop.eup %936 }
 0x1f4   :  { %v233_v51 = vmul.f32 0.6931472, %v937_v50 }
 0x1f6   :  { %v239_v54 = vsel %vm238_vm4, %v236_v52, %v233_v51  ;;  %v561_v51 = vld [vmem:[%s1234_s10] sm:$0xff]  ;;  %v562_v52 = vld [vmem:[%s1234_s10 + $0x8] sm:$0xff] }
 0x1f7   :  { %v1094_v55 = vadd.f32 %v239_v54, %v226_v53  ;;  %v894_v53 = vpack.c.bf16 %v562_v52, %v561_v51  ;;  %v563_v54 = vld [vmem:[%s1234_s10 + $0x10] sm:$0xff] }
 0x1f8   :  { %v898_v58 = vpack.c.bf16 %v564_v57, %v563_v54 }
 0x1f9   :  { %v665_v56 = vsub.f32 %v1094_v55, %v1089_v36  ;;  %773 = vmatprep.mubr.msk.f32.mxu0 %vm52_vm1, %v1094_v55  ;;  %895 = vmatprep.subr.bf16.mxu0 %v894_v53 }
 0x1fa   :  { %774 = vmatmul.mubr.msk.f32.vlgmr.msra.gmra.mrb[4].mxu0 %vm52_vm1, %v1089_v36 }
 0x1fb   :  { %897 = vmatpush3.bf16.msra.mxu0 %v894_v53 }
 0x1fc   :  { %899 = vmatprep.subr.bf16.mxu0 %v898_v58 }
 0x1ff   :  { %901 = vmatpush3.bf16.msra.mxu0 %v898_v58 }
 0x200   :  { %903 = vmatprep.subr.bf16.mxu0 %v902_v61 }
 0x203   :  { %905 = vmatpush3.bf16.msra.mxu0 %v902_v61 }
 0x204   :  { %907 = vmatprep.subr.bf16.mxu0 %v906_v0 }
 0x207   :  { %909 = vmatpush3.bf16.msra.mxu0 %v906_v0 }
 0x208   :  { %911 = vmatprep.subr.bf16.mxu0 %v910_v3 }
 0x20b   :  { %913 = vmatpush3.bf16.msra.mxu0 %v910_v3 }
 0x20c   :  { %915 = vmatprep.subr.bf16.mxu0 %v914_v6 }
 0x20f   :  { %917 = vmatpush3.bf16.msra.mxu0 %v914_v6 }
 0x210   :  { %919 = vmatprep.subr.bf16.mxu0 %v918_v9 }
 0x213   :  { %921 = vmatpush3.bf16.msra.mxu0 %v918_v9 }
 0x214   :  { %923 = vmatprep.subr.bf16.mxu0 %v922_v12 }
 0x217   :  { %925 = vmatpush3.bf16.msra.mxu0 %v922_v12 }
 0x2cd   :  { %v775_v18 = vpop.f32.mrb[4].mxu0 }
 0x2ce   :  { %v400_v19 = vadd.f32 %v775_v18, %v688_v17  ;;  %v394_v20 = vpop.f32.mrb[5].mxu0 }
 0x2cf   :  { %v395_v21 = vadd.f32 %v688_v17, %v394_v20 }
 0x2d0   :  { %v406_v22 = vand.u32 2147483647, %v400_v19  ;;  %v404_v47 = vmax.f32 %v400_v19, 0.0 }
 0x2d1   :  { %v405_v23 = vand.u32 2147483647, %v395_v21  ;;  %v403_v46 = vmax.f32 %v395_v21, 0.0 }
 0x2d2   :  { %v408_v24 = vsub.f32 0.0, %v406_v22 }
 0x2d3   :  { %v407_v25 = vsub.f32 0.0, %v405_v23 }
 0x2d4   :  { %v411_v26 = vmul.f32 1.442695, %v408_v24 }
 0x2d5   :  { %v409_v27 = vmul.f32 1.442695, %v407_v25 }
 0x2d6   :  { %938 = vpow2.f32 %v411_v26 }
 0x2d7   :  { %940 = vpow2.f32 %v409_v27 }
 0x2e0   :  { %v939_v28 = vpop.eup %938 }
 0x2e1   :  { %v941_v29 = vpop.eup %940  ;;  %v422_v30 = vadd.f32 1.0, %v939_v28  ;;  %v425_v32 = vmul.f32 -0.5, %v939_v28  ;;  %v428_v35 = vand.u32 2147483647, %v939_v28 }
 0x2e2   :  { %v413_v31 = vadd.f32 1.0, %v941_v29  ;;  %v416_v33 = vmul.f32 -0.5, %v941_v29  ;;  %v419_v38 = vand.u32 2147483647, %v941_v29 }
 0x2e3   :  { %942 = vlog2.f32 %v422_v30  ;;  %v426_v34 = vadd.f32 1.0, %v425_v32  ;;  %vm429_vm5 = vcmp.lt.f32.partialorder %v428_v35, 0.0004427343 }
 0x2e4   :  { %944 = vlog2.f32 %v413_v31  ;;  %v417_v37 = vadd.f32 1.0, %v416_v33  ;;  %vm420_vm6 = vcmp.lt.f32.partialorder %v419_v38, 0.0004427343 }
 0x2e5   :  { %v427_v42 = vmul.f32 %v939_v28, %v426_v34 }
 0x2e6   :  { %v418_v44 = vmul.f32 %v941_v29, %v417_v37 }
 0x2ed   :  { %v943_v39 = vpop.eup %942 }
 0x2ee   :  { %v945_v40 = vpop.eup %944  ;;  %v424_v41 = vmul.f32 0.6931472, %v943_v39 }
 0x2ef   :  { %v415_v43 = vmul.f32 0.6931472, %v945_v40 }
 0x2f0   :  { %v430_v45 = vsel %vm429_vm5, %v427_v42, %v424_v41 }
 0x2f1   :  { %v421_v48 = vsel %vm420_vm6, %v418_v44, %v415_v43  ;;  %v432_v50 = vadd.f32 %v430_v45, %v404_v47  ;;  %v692_v47 = vld [vmem:[%s1235_s11] ss:$0 sm:$0xff]  ;;  %s958_s11 = scalar_lea.vmem %s676_s17, 128 }
 0x2f2   :  { %v431_v49 = vadd.f32 %v421_v48, %v403_v46  ;;  %p959_p0 = scmp.ne.s32.totalorder %s676_s17, %s958_s11  ;;  %p964_p2 = scmp.lt.s32.totalorder %s958_s11, %s958_s11 }
 0x2f4   :  { %808 = vmatprep.mubr.f32.mxu1 %v431_v49  ;;  %p965_p3 = por %p964_p2, %p963_p1 }
 0x2f5   :  { %809 = vmatmul.mubr.f32.vlgmr.msra.gmra.mrb[2].mxu1 %v432_v50 }
 0x2f6   :  { %p966_p4 = pnand %p965_p3, %p959_p0 }
 0x3c8   :  { %v810_v14 = vpop.f32.mrb[2].mxu1 }
 0x3c9   :  { %v528_v15 = vadd.f32 %v810_v14, %v691_v13  ;;  %v522_v16 = vpop.f32.mrb[3].mxu1 }
 0x3ca   :  { %v523_v17 = vadd.f32 %v691_v13, %v522_v16 }
 0x3cb   :  { %v534_v18 = vand.u32 2147483647, %v528_v15  ;;  %v532_v43 = vmax.f32 %v528_v15, 0.0 }
 0x3cc   :  { %v533_v19 = vand.u32 2147483647, %v523_v17  ;;  %v531_v42 = vmax.f32 %v523_v17, 0.0 }
 0x3cd   :  { %v536_v20 = vsub.f32 0.0, %v534_v18 }
 0x3ce   :  { %v535_v21 = vsub.f32 0.0, %v533_v19 }
 0x3cf   :  { %v539_v22 = vmul.f32 1.442695, %v536_v20 }
 0x3d0   :  { %v537_v23 = vmul.f32 1.442695, %v535_v21 }
 0x3d1   :  { %946 = vpow2.f32 %v539_v22 }
 0x3d2   :  { %948 = vpow2.f32 %v537_v23 }
 0x3db   :  { %v947_v24 = vpop.eup %946 }
 0x3dc   :  { %v949_v25 = vpop.eup %948  ;;  %v550_v26 = vadd.f32 1.0, %v947_v24  ;;  %v553_v28 = vmul.f32 -0.5, %v947_v24  ;;  %v556_v31 = vand.u32 2147483647, %v947_v24 }
 0x3dd   :  { %v541_v27 = vadd.f32 1.0, %v949_v25  ;;  %v544_v29 = vmul.f32 -0.5, %v949_v25  ;;  %v547_v33 = vand.u32 2147483647, %v949_v25 }
 0x3de   :  { %950 = vlog2.f32 %v550_v26  ;;  %v554_v30 = vadd.f32 1.0, %v553_v28  ;;  %vm557_vm7 = vcmp.lt.f32.partialorder %v556_v31, 0.0004427343 }
 0x3df   :  { %952 = vlog2.f32 %v541_v27  ;;  %v545_v32 = vadd.f32 1.0, %v544_v29  ;;  %vm548_vm8 = vcmp.lt.f32.partialorder %v547_v33, 0.0004427343 }
 0x3e0   :  { %v555_v38 = vmul.f32 %v947_v24, %v554_v30 }
 0x3e1   :  { %v546_v40 = vmul.f32 %v949_v25, %v545_v32 }
 0x3e8   :  { %v951_v34 = vpop.eup %950 }
 0x3e9   :  { %v953_v35 = vpop.eup %952  ;;  %v552_v37 = vmul.f32 0.6931472, %v951_v34 }
 0x3ea   :  { %v543_v39 = vmul.f32 0.6931472, %v953_v35 }
 0x3eb   :  { %v558_v41 = vsel %vm557_vm7, %v555_v38, %v552_v37 }
 0x3ec   :  { %v549_v44 = vsel %vm548_vm8, %v546_v40, %v543_v39  ;;  %v560_v46 = vadd.f32 %v558_v41, %v532_v43 }
 0x3ed   :  { %v559_v45 = vadd.f32 %v549_v44, %v531_v42 }
 0x3ef   :  { %843 = vmatprep.mubr.f32.mxu0 %v559_v45 }
 0x3f0   :  { %844 = vmatmul.mubr.f32.vlgmr.msra.gmra.mrb[6].mxu0 %v560_v46 }
 0x4c3   :  { %v845_v48 = vpop.f32.mrb[6].mxu0 }
 0x4c4   :  { %v656_v49 = vadd.f32 %v845_v48, %v692_v47  ;;  %v650_v50 = vpop.f32.mrb[7].mxu0 }
 0x4c5   :  { %v651_v51 = vadd.f32 %v692_v47, %v650_v50 }
 0x4c7   :  { %v659_v52 = vsub.f32 %v651_v51, %v656_v49 }
 0x4c9   :  { %v660_v53 = vmul.f32 1.442695, %v659_v52 }
 0x4cb   :  { %954 = vpow2.f32 %v660_v53 }
 0x4d5   :  { %v955_v54 = vpop.eup %954 }
 0x4d6   :  { %v662_v57 = vadd.f32 1.0, %v955_v54 }
 0x4d8   :  { %956 = vrcp.f32 %v662_v57 }
 0x4e2   :  { %v957_v58 = vpop.eup %956 }
 0x4e3   :  { %v666_v59 = vmul.f32 %v957_v58, %v665_v56 }
 0x4e5   :  { %v667_v60 = vadd.f32 %v666_v59, %v1089_v36 }
 0x4e7   :  { %668 = vst.msk [vmem:[#allocation2] sm:$0xff] %vm52_vm1, %v667_v60 }
 0x4e8   :  { %969 = shalt.err (!%p966_p4)
}
 0x4e9   :  { %s970_s20 = scalar_lea.hbm %s1236_s12, 128 }
 0x4ea   :  { %p971_p5 = scmp.ne.s32.totalorder %s1236_s12, %s970_s20  ;;  %p974_p6 = scmp.lt.u32.totalorder %s970_s20, %s1236_s12 }
 0x4ec   :  { %p976_p7 = pnand %p974_p6, %p971_p5 }
 0x4ee   :  { %979 = shalt.err (!%p976_p7)
}
 0x4ef   :  { %678 = dma.vmem_to_hbm [thread:$0]  %s676_s17, 128, %s1236_s12, [#allocation3]  }
 0x4f0   :  { %980 = dma.done.wait [#allocation3], 128  }
 0x4f1   :  { %981 = vsyncadd [#allocation3], 4294967168 }
 0x4f2   :  { %682 = vsyncpa [#allocation3], 1 }

</bundles_post_ra>
